<compile_context>
chip_gen: v7x
topology: tpu7x:2x2x1
jax: 0.10.0
libtpu: 0.0.40
codegen_flags: <defaults>
</compile_context>

<pallas_src>
import functools

import jax
import jax.numpy as jnp
from jax import lax
from jax.experimental import pallas as pl
from jax.experimental.pallas import tpu as pltpu


def _hinge_kernel(o_ref, t_ref, acc_ref, *, strip_rows, nstrips, lanes):
    """Accumulate sum(max(1 - o*(2t-1), 0)) of one (tile_rows, lanes) block."""
    # Zero this core's resident accumulator block on its first tile.
    @pl.when(pl.program_id(1) == 0)
    def _():
        acc_ref[...] = jnp.zeros_like(acc_ref)

    def body(k, acc):
        r = pl.multiple_of(k * strip_rows, strip_rows)
        o = o_ref[pl.ds(r, strip_rows), :].astype(jnp.float32)
        t = t_ref[pl.ds(r, strip_rows), :].astype(jnp.float32) * 2.0 - 1.0
        h = jnp.maximum(1.0 - o * t, 0.0)
        # Tile-aligned fold onto an (8, lanes) slab: pure VPU adds.
        return acc + jnp.sum(h.reshape(strip_rows // 8, 8, lanes), axis=0)

    partial = lax.fori_loop(0, nstrips, body,
                            jnp.zeros((8, lanes), jnp.float32))
    acc_ref[...] += partial


def _hinge_sum(o, t):
    """Fused jnp tail path (order-independent sum of hinge terms)."""
    tf = t.astype(jnp.float32) * 2.0 - 1.0
    return jnp.sum(jnp.maximum(1.0 - o.astype(jnp.float32) * tf, 0.0))


def _num_tensorcores():
    """2 on v7x (2 TCs/chip), else 1 (v5e/v6e have a single TensorCore)."""
    try:
        kind = (jax.devices()[0].device_kind or "").lower()
    except Exception:
        return 1
    return 2 if ("v7" in kind or "7x" in kind) else 1


def _make_in_spec(tile_rows, lanes, idx_map, bufs):
    if bufs is not None:
        try:
            return pl.BlockSpec((tile_rows, lanes), idx_map,
                                pipeline_mode=pl.Buffered(bufs))
        except Exception:
            pass  # fall back to default double-buffering
    return pl.BlockSpec((tile_rows, lanes), idx_map)


def my_hinge_loss(output, target, *, tile_rows=4096, lanes=128,
                  strip_rows=256):
    """Pallas implementation of MyHingeLoss.forward. Returns an f32 scalar."""
    assert output.shape == target.shape, "output/target must match shapes"
    total_n = output.size

    # Flatten in native dtype (free bitcast; upcast happens in-kernel).
    flat_o = output.reshape(-1)
    flat_t = target.reshape(-1)

    # Dtype-aware sublane group (8 rows f32, 16 bf16, 32 int8).
    row_group = 8 * max(1, 4 // max(1, output.dtype.itemsize))
    row_group = max(row_group, 8 * max(1, 4 // max(1, target.dtype.itemsize)))

    # Rows (of 128 lanes) coverable with whole sublane groups.
    avail_rows = (total_n // (row_group * lanes)) * row_group
    if avail_rows == 0:
        # Input smaller than one aligned block: trivial pure-jnp path.
        return _hinge_sum(flat_o, flat_t) / jnp.float32(total_n)

    num_cores = _num_tensorcores()
    if avail_rows < num_cores * row_group:
        num_cores = 1

    # Exact, mask-free tiling: every core gets tiles_per_core FULL tiles.
    per_core_rows = (avail_rows // num_cores) // row_group * row_group
    tile_rows = min(tile_rows, per_core_rows)
    if tile_rows >= strip_rows:
        tile_rows -= tile_rows % strip_rows      # multiple of the strip size
        strip = strip_rows
    else:
        strip = tile_rows                        # small input: one strip
    nstrips = tile_rows // strip
    tiles_per_core = per_core_rows // tile_rows
    rows_main = num_cores * tiles_per_core * tile_rows
    n_main = rows_main * lanes

    # Main slab handled by the kernel (aligned case: zero-copy reshape).
    if n_main == total_n:
        o2d = flat_o.reshape(rows_main, lanes)
        t2d = flat_t.reshape(rows_main, lanes)
        tail = None
    else:
        o2d = flat_o[:n_main].reshape(rows_main, lanes)
        t2d = flat_t[:n_main].reshape(rows_main, lanes)
        # Small remainder folded by XLA (no pad, no in-kernel mask).
        tail = _hinge_sum(flat_o[n_main:], flat_t[n_main:])

    kernel = functools.partial(_hinge_kernel, strip_rows=strip,
                               nstrips=nstrips, lanes=lanes)

    def in_map(p, j):
        return (p * tiles_per_core + j, 0)

    in_spec = _make_in_spec(tile_rows, lanes, in_map,
                            bufs=3 if num_cores == 2 else None)

    bytes_in = n_main * (output.dtype.itemsize + target.dtype.itemsize)
    partials = pl.pallas_call(
        kernel,
        out_shape=jax.ShapeDtypeStruct((num_cores * 8, lanes), jnp.float32),
        grid_spec=pltpu.PrefetchScalarGridSpec(
            num_scalar_prefetch=0,
            grid=(num_cores, tiles_per_core),
            in_specs=[in_spec, in_spec],
            out_specs=pl.BlockSpec((8, lanes), lambda p, j: (p, 0)),
        ),
        compiler_params=pltpu.CompilerParams(
            dimension_semantics=("parallel", "arbitrary"),
        ),
        cost_estimate=pl.CostEstimate(
            flops=5 * n_main,
            transcendentals=0,
            bytes_accessed=bytes_in + num_cores * 8 * lanes * 4,
        ),
    )(o2d, t2d)

    total = jnp.sum(partials)
    if tail is not None:
        total = total + tail
    return total / jnp.float32(total_n)


def _reference(output, target):
    t = target.astype(jnp.float32) * 2.0 - 1.0
    return jnp.mean(jnp.maximum(1.0 - output.astype(jnp.float32) * t, 0.0))


def _check(shape, key):
    k1, k2 = jax.random.split(key)
    output = jax.random.normal(k1, shape, dtype=jnp.float32)
    target = jax.random.bernoulli(k2, 0.5, shape).astype(jnp.float32)
    loss = jax.block_until_ready(my_hinge_loss(output, target))
    ref = _reference(output, target)
    assert jnp.allclose(loss, ref, atol=1e-5, rtol=2e-5), (shape, loss, ref)


if __name__ == "__main__":
    key = jax.random.PRNGKey(0)
    k0, k1, k2 = jax.random.split(key, 3)

    # Primary small NCHW case (aligned: kernel covers everything, no tail).
    _check((2, 4, 16, 16), k0)
    # Ragged / unaligned case: exercises the wrapper tail fold (no pad/mask).
    _check((3, 5, 7, 11), k1)
    # Larger case: exercises multi-strip accumulation + non-tile-multiple rows.
    _check((5, 8, 80, 96), k2)

    print("KERNEL_OK")
</pallas_src>

<mosaic_0001>
module attributes {stable_mosaic.version = 11 : i64} {
  func.func @_hinge_kernel(%arg0: i32, %arg1: i32, %arg2: memref<16x128xf32, #tpu.memory_space<vmem>>, %arg3: memref<16x128xf32, #tpu.memory_space<vmem>>, %arg4: memref<8x128xf32, #tpu.memory_space<vmem>>) attributes {dimension_semantics = [#tpu.dimension_semantics<parallel>, #tpu.dimension_semantics<arbitrary>], iteration_bounds = array<i64: 1, 1>, scalar_prefetch = 0 : i64, scratch_operands = 0 : i64, tpu.core_type = #tpu.core_type<tc>, window_params = [{transform_indices = @transform_0, window_bounds = array<i64: 16, 128>}, {transform_indices = @transform_1, window_bounds = array<i64: 16, 128>}, {transform_indices = @transform_2, window_bounds = array<i64: 8, 128>}]} {
    %c0_i32 = arith.constant 0 : i32
    %0 = arith.cmpi eq, %arg1, %c0_i32 : i32
    %1 = arith.extui %0 : i1 to i32
    %c0_i32_0 = arith.constant 0 : i32
    %2 = arith.cmpi ne, %1, %c0_i32_0 : i32
    scf.if %2 {
      %cst_12 = arith.constant 0.000000e+00 : f32
      %25 = vector.broadcast %cst_12 : f32 to vector<8x128xf32>
      %c0_13 = arith.constant 0 : index
      %c0_14 = arith.constant 0 : index
      %26 = vector.load %arg4[%c0_13, %c0_14] : memref<8x128xf32, #tpu.memory_space<vmem>>, vector<8x128xf32>
      tpu.vector_store %arg4[%c0_13, %c0_14], %25 {strides = array<i32>} : memref<8x128xf32, #tpu.memory_space<vmem>>, vector<8x128xf32>,
    } else {
    }
    %cst = arith.constant 0.000000e+00 : f32
    %3 = vector.broadcast %cst : f32 to vector<8x128xf32>
    %c0_i32_1 = arith.constant 0 : i32
    %c16_i32 = arith.constant 16 : i32
    %4 = arith.muli %c0_i32_1, %c16_i32 : i32
    %5 = tpu.assume_multiple %4, 16 : i32
    %6 = arith.index_cast %5 : i32 to index
    %c0 = arith.constant 0 : index
    %7 = vector.load %arg2[%6, %c0] : memref<16x128xf32, #tpu.memory_space<vmem>>, vector<16x128xf32>
    %8 = arith.index_cast %5 : i32 to index
    %c0_2 = arith.constant 0 : index
    %9 = vector.load %arg3[%8, %c0_2] : memref<16x128xf32, #tpu.memory_space<vmem>>, vector<16x128xf32>
    %cst_3 = arith.constant 2.000000e+00 : f32
    %10 = vector.broadcast %cst_3 : f32 to vector<16x128xf32>
    %11 = arith.mulf %9, %10 : vector<16x128xf32>
    %cst_4 = arith.constant 1.000000e+00 : f32
    %12 = vector.broadcast %cst_4 : f32 to vector<16x128xf32>
    %13 = arith.subf %11, %12 : vector<16x128xf32>
    %14 = arith.mulf %7, %13 : vector<16x128xf32>
    %cst_5 = arith.constant 1.000000e+00 : f32
    %15 = vector.broadcast %cst_5 : f32 to vector<16x128xf32>
    %16 = arith.subf %15, %14 : vector<16x128xf32>
    %cst_6 = arith.constant 0.000000e+00 : f32
    %17 = vector.broadcast %cst_6 : f32 to vector<16x128xf32>
    %18 = arith.maximumf %16, %17 : vector<16x128xf32>
    %19 = vector.shape_cast %18 : vector<16x128xf32> to vector<2x8x128xf32>
    %cst_7 = arith.constant dense<0.000000e+00> : vector<8x128xf32>
    %20 = vector.multi_reduction <add>, %19, %cst_7 [0] : vector<2x8x128xf32> to vector<8x128xf32>
    %21 = arith.addf %3, %20 : vector<8x128xf32>
    %c1_i32 = arith.constant 1 : i32
    %c0_8 = arith.constant 0 : index
    %c0_9 = arith.constant 0 : index
    %22 = vector.load %arg4[%c0_8, %c0_9] : memref<8x128xf32, #tpu.memory_space<vmem>>, vector<8x128xf32>
    %23 = arith.addf %22, %21 : vector<8x128xf32>
    %c0_10 = arith.constant 0 : index
    %c0_11 = arith.constant 0 : index
    %24 = vector.load %arg4[%c0_10, %c0_11] : memref<8x128xf32, #tpu.memory_space<vmem>>, vector<8x128xf32>
    tpu.vector_store %arg4[%c0_10, %c0_11], %23 {strides = array<i32>} : memref<8x128xf32, #tpu.memory_space<vmem>>, vector<8x128xf32>,
    return
  }
  func.func @transform_0(%arg0: i32, %arg1: i32) -> (i32, i32) {
    %c1_i32 = arith.constant 1 : i32
    %0 = arith.muli %arg0, %c1_i32 : i32
    %1 = arith.addi %0, %arg1 : i32
    %c0_i32 = arith.constant 0 : i32
    %c0_i32_0 = arith.constant 0 : i32
    return %1, %c0_i32 : i32, i32
  }
  func.func @transform_1(%arg0: i32, %arg1: i32) -> (i32, i32) {
    %c1_i32 = arith.constant 1 : i32
    %0 = arith.muli %arg0, %c1_i32 : i32
    %1 = arith.addi %0, %arg1 : i32
    %c0_i32 = arith.constant 0 : i32
    %c0_i32_0 = arith.constant 0 : i32
    return %1, %c0_i32 : i32, i32
  }
  func.func @transform_2(%arg0: i32, %arg1: i32) -> (i32, i32) {
    %c0_i32 = arith.constant 0 : i32
    %c0_i32_0 = arith.constant 0 : i32
    return %arg0, %c0_i32 : i32, i32
  }
}

</mosaic_0001>

<bundles_post_ra>
// kernel: tpu_custom_call.1
= control target key start
LH: loop header
LB: loop body
LE: loop exit
PB: predicated region body
PF: predicated region fallthrough
CT: control target
= control target key end

     0   :  { %7 = vsyncpa [#allocation3], 0  ;;  %s228_s0 = inlined_call_operand.hbm [shape: f32[16,128], index: 0, kind: input, shape index: {}]   ;;  %s229_s1 = inlined_call_operand.hbm [shape: f32[16,128], index: 1, kind: input, shape index: {}]   ;;  %s230_s2 = inlined_call_operand.hbm [shape: f32[8,128], index: 2, kind: output, shape index: {}]  }
   0x1   :  { %8 = vsyncpa [#allocation6], 0 }
   0x2   :  { %9 = vsyncpa [#allocation4], 0  ;;  %s172_s9 = smov [#allocation2]   ;;  %s100_s13 = scalar_lea.hbm %s228_s0, 256 }
   0x3   :  { %s19_s10 = sshll.u32 %s172_s9, 4  ;;  %p101_p0 = scmp.ne.s32.totalorder %s228_s0, %s100_s13  ;;  %s20_s10 = int_to_ptr.vmem [resolvable:$true] %s19_s10 }
   0x4   :  { %p104_p1 = scmp.lt.u32.totalorder %s100_s13, %s228_s0 }
   0x6   :  { %p106_p2 = pnand %p104_p1, %p101_p0 }
   0x8   :  { %109 = shalt.err (!%p106_p2)
}
   0x9   :  { %s110_s18 = scalar_lea.vmem %s20_s10, 256  ;;  %p115_p4 = scmp.lt.s32.totalorder %s20_s10, %s20_s10 }
   0xa   :  { %p111_p3 = scmp.ne.s32.totalorder %s20_s10, %s110_s18  ;;  %p116_p5 = scmp.lt.s32.totalorder %s110_s18, %s110_s18 }
   0xc   :  { %p117_p6 = por %p116_p5, %p115_p4 }
   0xe   :  { %p118_p7 = pnand %p117_p6, %p111_p3 }
  0x10   :  { %121 = shalt.err (!%p118_p7)
}
  0x11   :  { %s173_s19 = smov 128   ;;  %s174_s20 = smov 8  }
  0x12   :  { %25 = dma.hbm_to_vmem [thread:$0]  %s228_s0, 256, %s20_s10, [#allocation3], %s173_s19, %s173_s19, %s174_s20  }
  0x13   :  { %s175_s23 = smov [#allocation5]   ;;  %s122_s27 = scalar_lea.hbm %s229_s1, 256 }
  0x14   :  { %s35_s24 = sshll.u32 %s175_s23, 4  ;;  %p123_p8 = scmp.ne.s32.totalorder %s229_s1, %s122_s27  ;;  %s36_s24 = int_to_ptr.vmem [resolvable:$true] %s35_s24 }
  0x15   :  { %p126_p9 = scmp.lt.u32.totalorder %s122_s27, %s229_s1 }
  0x17   :  { %p128_p10 = pnand %p126_p9, %p123_p8 }
  0x19   :  { %131 = shalt.err (!%p128_p10)
}
  0x1a   :  { %s132_s4 = scalar_lea.vmem %s36_s24, 256  ;;  %p137_p12 = scmp.lt.s32.totalorder %s36_s24, %s36_s24 }
  0x1b   :  { %p133_p11 = scmp.ne.s32.totalorder %s36_s24, %s132_s4  ;;  %p138_p13 = scmp.lt.s32.totalorder %s132_s4, %s132_s4 }
  0x1d   :  { %p139_p0 = por %p138_p13, %p137_p12 }
  0x1f   :  { %p140_p1 = pnand %p139_p0, %p133_p11 }
  0x21   :  { %143 = shalt.err (!%p140_p1)
}
  0x22   :  { %41 = dma.hbm_to_vmem [thread:$0]  %s229_s1, 256, %s36_s24, [#allocation6], %s173_s19, %s173_s19, %s174_s20  }
  0x23   :  { %166 = dma.done.wait [#allocation3], 256  }
  0x24   :  { %167 = vsyncadd [#allocation3], 4294967040 }
  0x25   :  { %168 = dma.done.wait [#allocation6], 256  }
  0x26   :  { %169 = vsyncadd [#allocation6], 4294967040  ;;  %v59_v0 = vld [vmem:[#allocation5] sm:$0xff]  ;;  %v60_v1 = vld [vmem:[#allocation5 + $0x8] sm:$0xff]  ;;  %s176_s6 = smov [#allocation7]  }
  0x27   :  { %v61_v2 = vmul.f32 2.0, %v59_v0  ;;  %v57_v3 = vld [vmem:[#allocation2] sm:$0xff]  ;;  %v62_v4 = vmul.f32 2.0, %v60_v1  ;;  %v58_v5 = vld [vmem:[#allocation2 + $0x8] sm:$0xff]  ;;  %s82_s1 = sshll.u32 %s176_s6, 4  ;;  %s83_s1 = int_to_ptr.vmem [resolvable:$true] %s82_s1 }
  0x28   :  { %s144_s7 = scalar_lea.vmem %s83_s1, 128  ;;  %p149_p3 = scmp.lt.s32.totalorder %s83_s1, %s83_s1 }
  0x29   :  { %v92_v6 = vadd.f32 -1.0, %v61_v2  ;;  %v93_v7 = vadd.f32 -1.0, %v62_v4  ;;  %p145_p2 = scmp.ne.s32.totalorder %s83_s1, %s144_s7  ;;  %p150_p4 = scmp.lt.s32.totalorder %s144_s7, %s144_s7 }
  0x2b   :  { %v65_v8 = vmul.f32 %v92_v6, %v57_v3  ;;  %v66_v9 = vmul.f32 %v93_v7, %v58_v5  ;;  %p151_p5 = por %p150_p4, %p149_p3 }
  0x2d   :  { %v67_v10 = vsub.f32 1.0, %v65_v8  ;;  %v68_v11 = vsub.f32 1.0, %v66_v9  ;;  %p152_p6 = pnand %p151_p5, %p145_p2 }
  0x2f   :  { %v69_v12 = vmax.f32 %v67_v10, 0.0  ;;  %v70_v13 = vmax.f32 %v68_v11, 0.0 }
  0x31   :  { %v71_v14 = vadd.f32 %v70_v13, %v69_v12 }
  0x33   :  { %75 = vst [vmem:[#allocation7] sm:$0xff] %v71_v14 }
  0x34   :  { %155 = shalt.err (!%p152_p6)
}
  0x35   :  { %s156_s10 = scalar_lea.hbm %s230_s2, 128 }
  0x36   :  { %p157_p7 = scmp.ne.s32.totalorder %s230_s2, %s156_s10  ;;  %p160_p8 = scmp.lt.u32.totalorder %s156_s10, %s230_s2 }
  0x38   :  { %p162_p9 = pnand %p160_p8, %p157_p7 }
  0x3a   :  { %165 = shalt.err (!%p162_p9)
}
  0x3b   :  { %85 = dma.vmem_to_hbm [thread:$0]  %s83_s1, 128, %s230_s2, [#allocation4]  }
  0x3c   :  { %170 = dma.done.wait [#allocation4], 128  }
  0x3d   :  { %171 = vsyncadd [#allocation4], 4294967168 }
  0x3e   :  { %89 = vsyncpa [#allocation3], 1 }
  0x3f   :  { %90 = vsyncpa [#allocation6], 1 }
  0x40   :  { %91 = vsyncpa [#allocation4], 1 }

</bundles_post_ra>
